<compile_context>
chip_gen: v5e
topology: v5e:2x2
jax: 0.10.0
libtpu: 0.0.40
codegen_flags: <defaults>
</compile_context>

<pallas_src>
import math
from functools import partial, reduce

import jax
import jax.numpy as jnp
from jax.experimental import pallas as pl
from jax.experimental.pallas import tpu as pltpu

LANE = 128
SUBLANE = 8
_VMEM_BUDGET = 26 * 1024 * 1024   # target per-step working set used for tile sizing
_VMEM_LIMIT = 44 * 1024 * 1024    # scoped VMEM limit handed to Mosaic (fits v7x's 64 MiB)


def _round_up(v, m):
    return (v + m - 1) // m * m


def im2col_nchw(x, k, stride):
    """Pure-JAX reference helper (only used for the correctness check in __main__)."""
    B, C, H, W = x.shape
    oh = (H - k) // stride + 1
    ow = (W - k) // stride + 1
    patches = []
    for kh in range(k):
        for kw in range(k):
            patches.append(
                x[:, :, kh:kh + stride * oh:stride, kw:kw + stride * ow:stride])
    p = jnp.stack(patches, axis=2)              # (B, C, k*k, oh, ow)
    return p.reshape(B, C * k * k, oh * ow)     # (B, CKK, P), patch order (c, kh, kw)


def _conv_fold_kernel(w_ref, b_ref, xm_ref, xh_ref, o_ref, col_ref, *,
                      taps, c_in_pad, tp):
    # w_ref:   (tco, KK*C_in_pad)        weights with taps folded into the contraction dim
    # b_ref:   (tco, 1)
    # xm_ref:  (1, C_all, tp)            this tile's slab of the flat (s2d) image
    # xh_ref:  (1, 1, C_all, halo_pad)   halo lanes (start of the next tile's slab)
    # o_ref:   (1, tco, tp)              lane-dense output tile
    # col_ref: VMEM scratch (KK*C_in_pad, tp) — fused im2col column block
    for t, (grp, off) in enumerate(taps):       # static, fully unrolled (k*k taps)
        r0 = t * c_in_pad
        g0 = grp * c_in_pad
        if off == 0:
            col_ref[r0:r0 + c_in_pad, :] = xm_ref[0, g0:g0 + c_in_pad, :]
        else:
            col_ref[r0:r0 + c_in_pad, :tp - off] = xm_ref[0, g0:g0 + c_in_pad, off:]
            col_ref[r0:r0 + c_in_pad, tp - off:] = xh_ref[0, 0, g0:g0 + c_in_pad, :off]
    # One big MXU matmul; accumulation happens inside the MXU (f32).
    acc = jnp.dot(w_ref[...], col_ref[...], preferred_element_type=jnp.float32)
    o_ref[0] = (acc + b_ref[...]).astype(o_ref.dtype)


@partial(jax.jit, static_argnames=("kernel_size", "stride", "tp", "compute_dtype"))
def conv2d_forward(x, weight, bias, kernel_size, stride=1, *, tp=None,
                   compute_dtype=jnp.float32):
    """x: (B, C_in, H, W); weight: (C_in, C_out, k, k) (reference storage layout);
       bias: (C_out, 1). Returns (B, C_out, out_h, out_w) f32.
       compute_dtype=jnp.bfloat16 halves operand DMA/VMEM and uses the fast MXU path
       (f32 accumulation); default f32 keeps tight numerical parity with the reference."""
    B, C_in, H, W = x.shape
    C_out = weight.shape[1]
    k = int(kernel_size)
    s = int(stride)
    out_h = (H - k) // s + 1
    out_w = (W - k) // s + 1

    # ---- space-to-depth geometry (in-kernel stride is always 1) ----
    kq = (k - 1) // s                     # spatial tap extent after folding phases
    H_s = out_h + kq
    W_s = out_w + kq

    itemsize = jnp.dtype(compute_dtype).itemsize
    pack = SUBLANE * (4 // itemsize)      # 8 for f32, 16 for bf16 (sublane packing)
    C_in_pad = _round_up(C_in, pack)
    C_out_pad = _round_up(C_out, SUBLANE)
    C_all = s * s * C_in_pad
    KK = k * k
    KKC = KK * C_in_pad

    # tap -> (phase-channel group, static lane offset in the flat s2d image)
    taps = tuple(((kh % s) * s + (kw % s), (kh // s) * W_s + (kw // s))
                 for kh in range(k) for kw in range(k))
    halo = kq * (W_s + 1)
    halo_pad = _round_up(max(halo, 1), LANE)

    # ---- output-tile (lane) size: big enough to amortize the halo, within VMEM budget ----
    Pw = out_h * W_s                                   # "wide" flattened output positions
    tp_min = max(LANE, _round_up(halo + 1, LANE))      # kernel assumes off < tp
    if tp is None:
        tp_sel = max(tp_min, min(_round_up(Pw, LANE),
                                 max(2048, _round_up(8 * halo, LANE))))

        def _vmem(t):                                  # per-step working-set estimate
            return (2 * C_all * t * itemsize           # x slab (double-buffered)
                    + 2 * C_all * halo_pad * itemsize  # halo slab
                    + 2 * C_out_pad * t * 4            # f32 output tile
                    + KKC * t * itemsize               # col scratch
                    + 2 * C_out_pad * KKC * itemsize)  # weights

        while tp_sel > tp_min and _vmem(tp_sel) > _VMEM_BUDGET:
            tp_sel = max(tp_min, _round_up(tp_sel // 2, LANE))
        # TODO(synk): for very large convs (k>=7 with C_in,C_out>=512) add a reduction grid
        # axis over taps/C_in (VMEM accumulator + pl.when init/finalize) for v7x's 64 MiB.
    else:
        tp_sel = max(tp_min, _round_up(int(tp), LANE))
    tp = tp_sel
    Pw_pad = _round_up(Pw, tp)
    num_p = Pw_pad // tp

    # Keep both v7x TensorCores busy even for B == 1 with a single P tile.
    n_co = 2 if (B * num_p == 1 and C_out_pad % (2 * SUBLANE) == 0) else 1
    tco = C_out_pad // n_co

    # ---- weights / bias: taps folded into the contraction dim (tap-major, channel-minor) ----
    w_eff = weight.reshape(C_out, C_in, k, k)          # module's raw reinterpreting reshape
    w_col = jnp.transpose(w_eff, (0, 2, 3, 1))         # (C_out, k, k, C_in)
    w_col = jnp.pad(w_col, ((0, C_out_pad - C_out), (0, 0), (0, 0),
                            (0, C_in_pad - C_in)))
    w_col = w_col.reshape(C_out_pad, KKC).astype(compute_dtype)
    bias_p = jnp.pad(bias.astype(jnp.float32), ((0, C_out_pad - C_out), (0, 0)))

    # ---- x: crop/pad -> space-to-depth -> flatten -> pad lanes (one pass over x) ----
    Hc, Wc = s * H_s, s * W_s
    x2 = x[:, :, :min(H, Hc), :min(W, Wc)]             # rows/cols beyond Hc/Wc are never read
    x2 = jnp.pad(x2, ((0, 0), (0, 0), (0, Hc - x2.shape[2]), (0, Wc - x2.shape[3])))
    x2 = x2.reshape(B, C_in, H_s, s, W_s, s).transpose(0, 3, 5, 1, 2, 4)
    x2 = jnp.pad(x2, ((0, 0), (0, 0), (0, 0),
                      (0, C_in_pad - C_in), (0, 0), (0, 0)))
    x_flat = x2.reshape(B, C_all, H_s * W_s).astype(compute_dtype)
    x_ext = jnp.pad(x_flat, ((0, 0), (0, 0),
                             (0, Pw_pad + halo_pad - H_s * W_s)))
    # Tiny per-tile halo array (≈ halo_pad/tp of x) — the only duplicated input bytes.
    x_halo = jnp.stack(
        [x_ext[:, :, (p + 1) * tp:(p + 1) * tp + halo_pad] for p in range(num_p)],
        axis=1)                                        # (B, num_p, C_all, halo_pad)

    kernel = partial(_conv_fold_kernel, taps=taps, c_in_pad=C_in_pad, tp=tp)

    out_wide = pl.pallas_call(
        kernel,
        out_shape=jax.ShapeDtypeStruct((B, C_out_pad, Pw_pad), jnp.float32),
        grid_spec=pltpu.PrefetchScalarGridSpec(
            num_scalar_prefetch=0,
            grid=(B, n_co, num_p),
            in_specs=[
                # weights / bias: index_map only depends on co -> resident per C_out tile
                pl.BlockSpec((tco, KKC), lambda b, co, p: (co, 0)),
                pl.BlockSpec((tco, 1), lambda b, co, p: (co, 0)),
                # flat x fed directly — Blocked tp-sized tiles, auto double-buffered
                pl.BlockSpec((1, C_all, tp), lambda b, co, p: (b, 0, p)),
                # per-tile halo lanes (start of the next tile's slab)
                pl.BlockSpec((1, 1, C_all, halo_pad), lambda b, co, p: (b, p, 0, 0)),
            ],
            out_specs=pl.BlockSpec((1, tco, tp), lambda b, co, p: (b, co, p)),
            scratch_shapes=[pltpu.VMEM((KKC, tp), compute_dtype)],
        ),
        compiler_params=pltpu.CompilerParams(
            dimension_semantics=("parallel", "parallel", "parallel"),
            vmem_limit_bytes=_VMEM_LIMIT,
        ),
    )(w_col, bias_p, x_ext, x_halo)

    # Drop channel/lane padding and the few junk columns (ow >= out_w), back to NCHW.
    out = out_wide[:, :C_out, :Pw].reshape(B, C_out, out_h, W_s)[:, :, :, :out_w]
    return out


if __name__ == "__main__":
    key = jax.random.PRNGKey(0)
    k_x, k_w, k_b = jax.random.split(key, 3)

    B, C_in, H, W = 2, 4, 16, 16
    C_out, ksize = 8, 3

    x = jax.random.normal(k_x, (B, C_in, H, W), dtype=jnp.float32)

    # Deterministic parameter init mirroring the reference's lazy init:
    # weights_scale = sqrt(prod(x.shape) / out_channels)
    weights_scale = math.sqrt(reduce(lambda a, b: a * b, x.shape) / C_out)
    weight = jax.random.normal(
        k_w, (C_in, C_out, ksize, ksize), dtype=jnp.float32) / weights_scale
    bias = jax.random.normal(k_b, (C_out, 1), dtype=jnp.float32) / weights_scale

    def reference(stride):
        oh = (H - ksize) // stride + 1
        ow = (W - ksize) // stride + 1
        cols = im2col_nchw(x, ksize, stride)                 # (B, CKK, P)
        w_col = weight.reshape(C_out, -1)                    # module's raw reshape
        return (jnp.einsum("ok,bkp->bop", w_col, cols) + bias[None]).reshape(
            B, C_out, oh, ow)

    # f32 path (default): tight parity with the reference, stride 1 and 2.
    refs = {}
    for stride in (1, 2):
        out = jax.block_until_ready(
            conv2d_forward(x, weight, bias, kernel_size=ksize, stride=stride))
        ref = refs[stride] = reference(stride)
        assert out.shape == ref.shape, (stride, out.shape, ref.shape)
        max_err = float(jnp.max(jnp.abs(out - ref)))
        assert jnp.allclose(out, ref, atol=1e-4, rtol=1e-4), (stride, max_err)

    # bf16 fast path (f32 accumulation) — looser tolerance is expected.
    out_bf16 = jax.block_until_ready(
        conv2d_forward(x, weight, bias, kernel_size=ksize, stride=1,
                       compute_dtype=jnp.bfloat16))
    max_err_bf16 = float(jnp.max(jnp.abs(out_bf16 - refs[1])))
    assert jnp.allclose(out_bf16, refs[1], atol=5e-2, rtol=5e-2), max_err_bf16

    print("KERNEL_OK")
</pallas_src>

<mosaic_0001>
module attributes {stable_mosaic.version = 11 : i64} {
  func.func @_conv_fold_kernel(%arg0: i32, %arg1: i32, %arg2: i32, %arg3: memref<8x72xf32, #tpu.memory_space<vmem>>, %arg4: memref<8x1xf32, #tpu.memory_space<vmem>>, %arg5: memref<1x8x256xf32, #tpu.memory_space<vmem>>, %arg6: memref<1x1x8x128xf32, #tpu.memory_space<vmem>>, %arg7: memref<1x8x256xf32, #tpu.memory_space<vmem>>, %arg8: memref<72x256xf32, #tpu.memory_space<vmem>>) attributes {dimension_semantics = [#tpu.dimension_semantics<parallel>, #tpu.dimension_semantics<parallel>, #tpu.dimension_semantics<parallel>], iteration_bounds = array<i64: 2, 1, 1>, scalar_prefetch = 0 : i64, scratch_operands = 1 : i64, tpu.core_type = #tpu.core_type<tc>, window_params = [{transform_indices = @transform_0, window_bounds = array<i64: 8, 72>}, {transform_indices = @transform_1, window_bounds = array<i64: 8, 1>}, {transform_indices = @transform_2, window_bounds = array<i64: 1, 8, 256>}, {transform_indices = @transform_3, window_bounds = array<i64: 1, 1, 8, 128>}, {transform_indices = @transform_4, window_bounds = array<i64: 1, 8, 256>}]} {
    %c0 = arith.constant 0 : index
    %c0_0 = arith.constant 0 : index
    %c0_1 = arith.constant 0 : index
    %0 = vector.load %arg5[%c0, %c0_0, %c0_1] : memref<1x8x256xf32, #tpu.memory_space<vmem>>, vector<1x8x256xf32>
    %1 = vector.shape_cast %0 : vector<1x8x256xf32> to vector<8x256xf32>
    %c0_2 = arith.constant 0 : index
    %c0_3 = arith.constant 0 : index
    %2 = vector.load %arg8[%c0_2, %c0_3] : memref<72x256xf32, #tpu.memory_space<vmem>>, vector<8x256xf32>
    tpu.vector_store %arg8[%c0_2, %c0_3], %1 {strides = array<i32>} : memref<72x256xf32, #tpu.memory_space<vmem>>, vector<8x256xf32>,
    %c0_4 = arith.constant 0 : index
    %c0_5 = arith.constant 0 : index
    %c1 = arith.constant 1 : index
    %3 = vector.load %arg5[%c0_4, %c0_5, %c1] : memref<1x8x256xf32, #tpu.memory_space<vmem>>, vector<1x8x255xf32>
    %4 = vector.shape_cast %3 : vector<1x8x255xf32> to vector<8x255xf32>
    %c8 = arith.constant 8 : index
    %c0_6 = arith.constant 0 : index
    %5 = vector.load %arg8[%c8, %c0_6] : memref<72x256xf32, #tpu.memory_space<vmem>>, vector<8x255xf32>
    tpu.vector_store %arg8[%c8, %c0_6], %4 {strides = array<i32>} : memref<72x256xf32, #tpu.memory_space<vmem>>, vector<8x255xf32>,
    %c0_7 = arith.constant 0 : index
    %c0_8 = arith.constant 0 : index
    %c0_9 = arith.constant 0 : index
    %c0_10 = arith.constant 0 : index
    %6 = vector.load %arg6[%c0_7, %c0_8, %c0_9, %c0_10] : memref<1x1x8x128xf32, #tpu.memory_space<vmem>>, vector<1x1x8x1xf32>
    %7 = vector.shape_cast %6 : vector<1x1x8x1xf32> to vector<8x1xf32>
    %c8_11 = arith.constant 8 : index
    %c255 = arith.constant 255 : index
    %8 = vector.load %arg8[%c8_11, %c255] : memref<72x256xf32, #tpu.memory_space<vmem>>, vector<8x1xf32>
    tpu.vector_store %arg8[%c8_11, %c255], %7 {strides = array<i32>} : memref<72x256xf32, #tpu.memory_space<vmem>>, vector<8x1xf32>,
    %c0_12 = arith.constant 0 : index
    %c0_13 = arith.constant 0 : index
    %c2 = arith.constant 2 : index
    %9 = vector.load %arg5[%c0_12, %c0_13, %c2] : memref<1x8x256xf32, #tpu.memory_space<vmem>>, vector<1x8x254xf32>
    %10 = vector.shape_cast %9 : vector<1x8x254xf32> to vector<8x254xf32>
    %c16 = arith.constant 16 : index
    %c0_14 = arith.constant 0 : index
    %11 = vector.load %arg8[%c16, %c0_14] : memref<72x256xf32, #tpu.memory_space<vmem>>, vector<8x254xf32>
    tpu.vector_store %arg8[%c16, %c0_14], %10 {strides = array<i32>} : memref<72x256xf32, #tpu.memory_space<vmem>>, vector<8x254xf32>,
    %c0_15 = arith.constant 0 : index
    %c0_16 = arith.constant 0 : index
    %c0_17 = arith.constant 0 : index
    %c0_18 = arith.constant 0 : index
    %12 = vector.load %arg6[%c0_15, %c0_16, %c0_17, %c0_18] : memref<1x1x8x128xf32, #tpu.memory_space<vmem>>, vector<1x1x8x2xf32>
    %13 = vector.shape_cast %12 : vector<1x1x8x2xf32> to vector<8x2xf32>
    %c16_19 = arith.constant 16 : index
    %c254 = arith.constant 254 : index
    %14 = vector.load %arg8[%c16_19, %c254] : memref<72x256xf32, #tpu.memory_space<vmem>>, vector<8x2xf32>
    tpu.vector_store %arg8[%c16_19, %c254], %13 {strides = array<i32>} : memref<72x256xf32, #tpu.memory_space<vmem>>, vector<8x2xf32>,
    %c0_20 = arith.constant 0 : index
    %c0_21 = arith.constant 0 : index
    %c16_22 = arith.constant 16 : index
    %15 = vector.load %arg5[%c0_20, %c0_21, %c16_22] : memref<1x8x256xf32, #tpu.memory_space<vmem>>, vector<1x8x240xf32>
    %16 = vector.shape_cast %15 : vector<1x8x240xf32> to vector<8x240xf32>
    %c24 = arith.constant 24 : index
    %c0_23 = arith.constant 0 : index
    %17 = vector.load %arg8[%c24, %c0_23] : memref<72x256xf32, #tpu.memory_space<vmem>>, vector<8x240xf32>
    tpu.vector_store %arg8[%c24, %c0_23], %16 {strides = array<i32>} : memref<72x256xf32, #tpu.memory_space<vmem>>, vector<8x240xf32>,
    %c0_24 = arith.constant 0 : index
    %c0_25 = arith.constant 0 : index
    %c0_26 = arith.constant 0 : index
    %c0_27 = arith.constant 0 : index
    %18 = vector.load %arg6[%c0_24, %c0_25, %c0_26, %c0_27] : memref<1x1x8x128xf32, #tpu.memory_space<vmem>>, vector<1x1x8x16xf32>
    %19 = vector.shape_cast %18 : vector<1x1x8x16xf32> to vector<8x16xf32>
    %c24_28 = arith.constant 24 : index
    %c240 = arith.constant 240 : index
    %20 = vector.load %arg8[%c24_28, %c240] : memref<72x256xf32, #tpu.memory_space<vmem>>, vector<8x16xf32>
    tpu.vector_store %arg8[%c24_28, %c240], %19 {strides = array<i32>} : memref<72x256xf32, #tpu.memory_space<vmem>>, vector<8x16xf32>,
    %c0_29 = arith.constant 0 : index
    %c0_30 = arith.constant 0 : index
    %c17 = arith.constant 17 : index
    %21 = vector.load %arg5[%c0_29, %c0_30, %c17] : memref<1x8x256xf32, #tpu.memory_space<vmem>>, vector<1x8x239xf32>
    %22 = vector.shape_cast %21 : vector<1x8x239xf32> to vector<8x239xf32>
    %c32 = arith.constant 32 : index
    %c0_31 = arith.constant 0 : index
    %23 = vector.load %arg8[%c32, %c0_31] : memref<72x256xf32, #tpu.memory_space<vmem>>, vector<8x239xf32>
    tpu.vector_store %arg8[%c32, %c0_31], %22 {strides = array<i32>} : memref<72x256xf32, #tpu.memory_space<vmem>>, vector<8x239xf32>,
    %c0_32 = arith.constant 0 : index
    %c0_33 = arith.constant 0 : index
    %c0_34 = arith.constant 0 : index
    %c0_35 = arith.constant 0 : index
    %24 = vector.load %arg6[%c0_32, %c0_33, %c0_34, %c0_35] : memref<1x1x8x128xf32, #tpu.memory_space<vmem>>, vector<1x1x8x17xf32>
    %25 = vector.shape_cast %24 : vector<1x1x8x17xf32> to vector<8x17xf32>
    %c32_36 = arith.constant 32 : index
    %c239 = arith.constant 239 : index
    %26 = vector.load %arg8[%c32_36, %c239] : memref<72x256xf32, #tpu.memory_space<vmem>>, vector<8x17xf32>
    tpu.vector_store %arg8[%c32_36, %c239], %25 {strides = array<i32>} : memref<72x256xf32, #tpu.memory_space<vmem>>, vector<8x17xf32>,
    %c0_37 = arith.constant 0 : index
    %c0_38 = arith.constant 0 : index
    %c18 = arith.constant 18 : index
    %27 = vector.load %arg5[%c0_37, %c0_38, %c18] : memref<1x8x256xf32, #tpu.memory_space<vmem>>, vector<1x8x238xf32>
    %28 = vector.shape_cast %27 : vector<1x8x238xf32> to vector<8x238xf32>
    %c40 = arith.constant 40 : index
    %c0_39 = arith.constant 0 : index
    %29 = vector.load %arg8[%c40, %c0_39] : memref<72x256xf32, #tpu.memory_space<vmem>>, vector<8x238xf32>
    tpu.vector_store %arg8[%c40, %c0_39], %28 {strides = array<i32>} : memref<72x256xf32, #tpu.memory_space<vmem>>, vector<8x238xf32>,
    %c0_40 = arith.constant 0 : index
    %c0_41 = arith.constant 0 : index
    %c0_42 = arith.constant 0 : index
    %c0_43 = arith.constant 0 : index
    %30 = vector.load %arg6[%c0_40, %c0_41, %c0_42, %c0_43] : memref<1x1x8x128xf32, #tpu.memory_space<vmem>>, vector<1x1x8x18xf32>
    %31 = vector.shape_cast %30 : vector<1x1x8x18xf32> to vector<8x18xf32>
    %c40_44 = arith.constant 40 : index
    %c238 = arith.constant 238 : index
    %32 = vector.load %arg8[%c40_44, %c238] : memref<72x256xf32, #tpu.memory_space<vmem>>, vector<8x18xf32>
    tpu.vector_store %arg8[%c40_44, %c238], %31 {strides = array<i32>} : memref<72x256xf32, #tpu.memory_space<vmem>>, vector<8x18xf32>,
    %c0_45 = arith.constant 0 : index
    %c0_46 = arith.constant 0 : index
    %c32_47 = arith.constant 32 : index
    %33 = vector.load %arg5[%c0_45, %c0_46, %c32_47] : memref<1x8x256xf32, #tpu.memory_space<vmem>>, vector<1x8x224xf32>
    %34 = vector.shape_cast %33 : vector<1x8x224xf32> to vector<8x224xf32>
    %c48 = arith.constant 48 : index
    %c0_48 = arith.constant 0 : index
    %35 = vector.load %arg8[%c48, %c0_48] : memref<72x256xf32, #tpu.memory_space<vmem>>, vector<8x224xf32>
    tpu.vector_store %arg8[%c48, %c0_48], %34 {strides = array<i32>} : memref<72x256xf32, #tpu.memory_space<vmem>>, vector<8x224xf32>,
    %c0_49 = arith.constant 0 : index
    %c0_50 = arith.constant 0 : index
    %c0_51 = arith.constant 0 : index
    %c0_52 = arith.constant 0 : index
    %36 = vector.load %arg6[%c0_49, %c0_50, %c0_51, %c0_52] : memref<1x1x8x128xf32, #tpu.memory_space<vmem>>, vector<1x1x8x32xf32>
    %37 = vector.shape_cast %36 : vector<1x1x8x32xf32> to vector<8x32xf32>
    %c48_53 = arith.constant 48 : index
    %c224 = arith.constant 224 : index
    %38 = vector.load %arg8[%c48_53, %c224] : memref<72x256xf32, #tpu.memory_space<vmem>>, vector<8x32xf32>
    tpu.vector_store %arg8[%c48_53, %c224], %37 {strides = array<i32>} : memref<72x256xf32, #tpu.memory_space<vmem>>, vector<8x32xf32>,
    %c0_54 = arith.constant 0 : index
    %c0_55 = arith.constant 0 : index
    %c33 = arith.constant 33 : index
    %39 = vector.load %arg5[%c0_54, %c0_55, %c33] : memref<1x8x256xf32, #tpu.memory_space<vmem>>, vector<1x8x223xf32>
    %40 = vector.shape_cast %39 : vector<1x8x223xf32> to vector<8x223xf32>
    %c56 = arith.constant 56 : index
    %c0_56 = arith.constant 0 : index
    %41 = vector.load %arg8[%c56, %c0_56] : memref<72x256xf32, #tpu.memory_space<vmem>>, vector<8x223xf32>
    tpu.vector_store %arg8[%c56, %c0_56], %40 {strides = array<i32>} : memref<72x256xf32, #tpu.memory_space<vmem>>, vector<8x223xf32>,
    %c0_57 = arith.constant 0 : index
    %c0_58 = arith.constant 0 : index
    %c0_59 = arith.constant 0 : index
    %c0_60 = arith.constant 0 : index
    %42 = vector.load %arg6[%c0_57, %c0_58, %c0_59, %c0_60] : memref<1x1x8x128xf32, #tpu.memory_space<vmem>>, vector<1x1x8x33xf32>
    %43 = vector.shape_cast %42 : vector<1x1x8x33xf32> to vector<8x33xf32>
    %c56_61 = arith.constant 56 : index
    %c223 = arith.constant 223 : index
    %44 = vector.load %arg8[%c56_61, %c223] : memref<72x256xf32, #tpu.memory_space<vmem>>, vector<8x33xf32>
    tpu.vector_store %arg8[%c56_61, %c223], %43 {strides = array<i32>} : memref<72x256xf32, #tpu.memory_space<vmem>>, vector<8x33xf32>,
    %c0_62 = arith.constant 0 : index
    %c0_63 = arith.constant 0 : index
    %c34 = arith.constant 34 : index
    %45 = vector.load %arg5[%c0_62, %c0_63, %c34] : memref<1x8x256xf32, #tpu.memory_space<vmem>>, vector<1x8x222xf32>
    %46 = vector.shape_cast %45 : vector<1x8x222xf32> to vector<8x222xf32>
    %c64 = arith.constant 64 : index
    %c0_64 = arith.constant 0 : index
    %47 = vector.load %arg8[%c64, %c0_64] : memref<72x256xf32, #tpu.memory_space<vmem>>, vector<8x222xf32>
    tpu.vector_store %arg8[%c64, %c0_64], %46 {strides = array<i32>} : memref<72x256xf32, #tpu.memory_space<vmem>>, vector<8x222xf32>,
    %c0_65 = arith.constant 0 : index
    %c0_66 = arith.constant 0 : index
    %c0_67 = arith.constant 0 : index
    %c0_68 = arith.constant 0 : index
    %48 = vector.load %arg6[%c0_65, %c0_66, %c0_67, %c0_68] : memref<1x1x8x128xf32, #tpu.memory_space<vmem>>, vector<1x1x8x34xf32>
    %49 = vector.shape_cast %48 : vector<1x1x8x34xf32> to vector<8x34xf32>
    %c64_69 = arith.constant 64 : index
    %c222 = arith.constant 222 : index
    %50 = vector.load %arg8[%c64_69, %c222] : memref<72x256xf32, #tpu.memory_space<vmem>>, vector<8x34xf32>
    tpu.vector_store %arg8[%c64_69, %c222], %49 {strides = array<i32>} : memref<72x256xf32, #tpu.memory_space<vmem>>, vector<8x34xf32>,
    %c0_70 = arith.constant 0 : index
    %c0_71 = arith.constant 0 : index
    %51 = vector.load %arg3[%c0_70, %c0_71] : memref<8x72xf32, #tpu.memory_space<vmem>>, vector<8x72xf32>
    %c0_72 = arith.constant 0 : index
    %c0_73 = arith.constant 0 : index
    %52 = vector.load %arg8[%c0_72, %c0_73] : memref<72x256xf32, #tpu.memory_space<vmem>>, vector<72x256xf32>
    %cst = arith.constant dense<0.000000e+00> : vector<8x256xf32>
    %53 = tpu.matmul %51, %52, %cst {dimension_numbers = #tpu.dot_dimension_numbers<[1], [0], [0], [1], [0, 0, 1, 1], [], []>} : vector<8x72xf32>, vector<72x256xf32>, vector<8x256xf32> -> vector<8x256xf32>
    %c0_74 = arith.constant 0 : index
    %c0_75 = arith.constant 0 : index
    %54 = vector.load %arg4[%c0_74, %c0_75] : memref<8x1xf32, #tpu.memory_space<vmem>>, vector<8x1xf32>
    %55 = vector.broadcast %54 : vector<8x1xf32> to vector<8x256xf32>
    %56 = arith.addf %53, %55 : vector<8x256xf32>
    %c0_76 = arith.constant 0 : index
    %c0_77 = arith.constant 0 : index
    %c0_78 = arith.constant 0 : index
    %57 = vector.load %arg7[%c0_76, %c0_77, %c0_78] : memref<1x8x256xf32, #tpu.memory_space<vmem>>, vector<1x8x256xf32>
    %58 = vector.shape_cast %57 : vector<1x8x256xf32> to vector<8x256xf32>
    %59 = vector.shape_cast %56 : vector<8x256xf32> to vector<1x8x256xf32>
    tpu.vector_store %arg7[%c0_76, %c0_77, %c0_78], %59 {strides = array<i32>} : memref<1x8x256xf32, #tpu.memory_space<vmem>>, vector<1x8x256xf32>,
    return
  }
  func.func @transform_0(%arg0: i32, %arg1: i32, %arg2: i32) -> (i32, i32) {
    %c0_i32 = arith.constant 0 : i32
    %c0_i32_0 = arith.constant 0 : i32
    return %arg1, %c0_i32 : i32, i32
  }
  func.func @transform_1(%arg0: i32, %arg1: i32, %arg2: i32) -> (i32, i32) {
    %c0_i32 = arith.constant 0 : i32
    %c0_i32_0 = arith.constant 0 : i32
    return %arg1, %c0_i32 : i32, i32
  }
  func.func @transform_2(%arg0: i32, %arg1: i32, %arg2: i32) -> (i32, i32, i32) {
    %c0_i32 = arith.constant 0 : i32
    %c0_i32_0 = arith.constant 0 : i32
    return %arg0, %c0_i32, %arg2 : i32, i32, i32
  }
  func.func @transform_3(%arg0: i32, %arg1: i32, %arg2: i32) -> (i32, i32, i32, i32) {
    %c0_i32 = arith.constant 0 : i32
    %c0_i32_0 = arith.constant 0 : i32
    %c0_i32_1 = arith.constant 0 : i32
    return %arg0, %arg2, %c0_i32, %c0_i32_0 : i32, i32, i32, i32
  }
  func.func @transform_4(%arg0: i32, %arg1: i32, %arg2: i32) -> (i32, i32, i32) {
    %c0_i32 = arith.constant 0 : i32
    return %arg0, %arg1, %arg2 : i32, i32, i32
  }
}

</mosaic_0001>

<bundles_post_ra>
// kernel: conv2d_forward.1
= control target key start
LH: loop header
LB: loop body
LE: loop exit
PB: predicated region body
PF: predicated region fallthrough
CT: control target
= control target key end

     0   :  { %s839_s15 = smov 0   ;;  %s841_s16 = smov 0   ;;  %s908_s0 = inlined_call_operand.vmem [shape: f32[8,72], index: 0, kind: input, shape index: {}]   ;;  %s909_s1 = inlined_call_operand.vmem [shape: f32[8,1], index: 1, kind: input, shape index: {}]   ;;  %s910_s2 = inlined_call_operand.vmem [shape: f32[2,8,384], index: 2, kind: input, shape index: {}]   ;;  %s911_s3 = inlined_call_operand.vmem [shape: f32[2,1,8,128], index: 3, kind: input, shape index: {}]   ;;  %s912_s4 = inlined_call_operand.vmem [shape: f32[2,8,256], index: 4, kind: output, shape index: {}]  }
   0x1   :  { %s843_s17 = smov 0  }
   0x2 LB: > { %s33_s18 = sadd.s32 1, %s799_s16  ;;  %p736_p0 = scmp.ge.s32.totalorder %s803_s17, 1  ;;  %s803_s17 = sphi %s843_s17, %s14_s17   ;;  %s799_s16 = sphi %s841_s16, %s914_s16   ;;  %s795_s15 = sphi %s839_s15, %s913_s15  }
   0x3   : > { %p35_p1 = scmp.ge.s32.totalorder %s33_s18, 2  ;;  %p232_p2 = scmp.lt.s32.totalorder %s803_s17, 3 }
   0x5   : > { %s916_s18 = smov (%p35_p1, %s33_s18), 0  ;;  %p233_p3 = pnand %p736_p0, %p232_p2 }
   0x6   : > { %p302_p4 = scmp.lt.s32.totalorder (!%p233_p3), %s795_s15, 1  ;;  %s805_s27 = smov (!%p233_p3), 94  }
   0x7   : > { %236 = sbr.rel (%p233_p3) target bundleno = 328 (0x148), region = 36  ;;  %s806_s28 = smov (!%p233_p3), 95  }
   0x8   : > { %s807_s29 = smov (!%p233_p3), 96   ;;  %s808_s30 = smov (!%p233_p3), 110  }
   0x9   : > { %s809_s5 = smov (!%p233_p3), 111   ;;  %s810_s6 = smov (!%p233_p3), 112  }
   0xa   : > { %s811_s7 = smov (!%p233_p3), 126   ;;  %s812_s8 = smov (!%p233_p3), 127  }
   0xc   : > { %s918_s15 = smov (!%p302_p4, %s795_s15), 1  ;;  %vm474_vm0 = vcmask 777216   ;;  %vm485_vm1 = vcmask 1048312   ;;  %vm495_vm2 = vcmask 769024   ;;  %vm506_vm3 = vcmask 1048304   ;;  %v527_v28 = vld [vmem:[%s909_s1] sm:$0xff] }
   0xd   : > { %s738_s19 = sshll.u32 %s918_s15, 3  ;;  %s746_s20 = smul.u32 24, %s918_s15  ;;  %vm453_vm4 = vcmask 785408   ;;  %vm464_vm5 = vcmask 1048320   ;;  %vm432_vm6 = vcmask 900096   ;;  %vm443_vm7 = vcmask 1048432  }
   0xe   : > { %s321_s23 = scalar_lea.vmem %s911_s3, %s738_s19  ;;  %vm411_vm8 = vcmask 908288   ;;  %vm422_vm9 = vcmask 1048440   ;;  %vm390_vm10 = vcmask 916480   ;;  %v813_v29 = vmov 0   ;;  %v508_v44 = vld [vmem:[%s908_s0] sm:$0xff]  ;;  %s745_s13 = sshll.u32 %s918_s15, 4 }
   0xf   : > { %v501_v0 = vld [vmem:[%s321_s23] sm:$0xff]  ;;  %s309_s26 = scalar_lea.vmem %s910_s2, %s746_s20  ;;  %780 = vset.pattern.permute.xlu0 %v813_v29  ;;  %vm401_vm11 = vcmask 1048448   ;;  %vm369_vm12 = vcmask 1031168   ;;  %vm380_vm13 = vcmask 1048560   ;;  %vm348_vm14 = vcmask 1039360   ;;  %s334_s20 = scalar_lea.vmem %s912_s4, %s745_s13 }
  0x10   : > { %503 = vrot.lane.b32.xlu1 %v501_v0, %s805_s27  ;;  %v867_v1 = vld [vmem:[%s309_s26] sm:$0xff]  ;;  %482 = vrot.lane.b32.xlu2 %v501_v0, %s806_s28  ;;  %v870_v2 = vld [vmem:[%s309_s26 + $0x8] sm:$0xff]  ;;  %vm359_vm15 = vcmask 1048568  }
  0x11   : > { %491 = vrot.lane.b32.xlu0 %v867_v1, %s805_s27 }
  0x18   : > { %470 = vrot.lane.b32.xlu1 %v867_v1, %s806_s28  ;;  %472 = vrot.lane.b32.xlu2 %v870_v2, %s806_s28 }
  0x19   : > { %493 = vrot.lane.b32.xlu0 %v870_v2, %s805_s27 }
  0x20   : > { %451 = vrot.lane.b32.xlu1 %v870_v2, %s807_s29  ;;  %461 = vrot.lane.b32.xlu2 %v501_v0, %s807_s29 }
  0x21   : > { %449 = vrot.lane.b32.xlu0 %v867_v1, %s807_s29 }
  0x28   : > { %430 = vrot.lane.b32.xlu1 %v870_v2, %s808_s30  ;;  %440 = vrot.lane.b32.xlu2 %v501_v0, %s808_s30 }
  0x29   : > { %428 = vrot.lane.b32.xlu0 %v867_v1, %s808_s30 }
  0x30   : > { %409 = vrot.lane.b32.xlu1 %v870_v2, %s809_s5  ;;  %419 = vrot.lane.b32.xlu2 %v501_v0, %s809_s5 }
  0x31   : > { %407 = vrot.lane.b32.xlu0 %v867_v1, %s809_s5 }
  0x38   : > { %388 = vrot.lane.b32.xlu1 %v870_v2, %s810_s6  ;;  %398 = vrot.lane.b32.xlu2 %v501_v0, %s810_s6 }
  0x39   : > { %386 = vrot.lane.b32.xlu0 %v867_v1, %s810_s6 }
  0x40   : > { %367 = vrot.lane.b32.xlu1 %v870_v2, %s811_s7  ;;  %377 = vrot.lane.b32.xlu2 %v501_v0, %s811_s7 }
  0x41   : > { %365 = vrot.lane.b32.xlu0 %v867_v1, %s811_s7 }
  0x48   : > { %346 = vrot.lane.b32.xlu1 %v870_v2, %s812_s8  ;;  %356 = vrot.lane.b32.xlu2 %v501_v0, %s812_s8 }
  0x49   : > { %344 = vrot.lane.b32.xlu0 %v867_v1, %s812_s8 }
  0x51   : > { %530 = vperm.xlu0 %780, %v527_v28  }
  0x6a   : > { %v483_v3 = vpop.permute.xlu2 %482 }
  0x72   : > { %v473_v4 = vpop.permute.xlu2 %472 }
  0x73   : > { %479 = vst.msk [vmem:[#allocation2 + $0x78] sm:$0xff] %vm474_vm0, %v473_v4 }
  0x74   : > { %486 = vst.msk [vmem:[#allocation2 + $0x78] sm:$0xff] %vm485_vm1, %v483_v3 }
  0x7a   : > { %v462_v7 = vpop.permute.xlu2 %461 }
  0x7b   : > { %v524_v17 = vld [vmem:[#allocation2 + $0x78] sm:$0xff] }
  0x82   : > { %v504_v5 = vpop.permute.xlu1 %503  ;;  %v441_v12 = vpop.permute.xlu2 %440 }
  0x83   : > { %v492_v6 = vpop.permute.xlu0 %491 }
  0x8a   : > { %v471_v8 = vpop.permute.xlu1 %470  ;;  %v420_v21 = vpop.permute.xlu2 %419 }
  0x8b   : > { %v494_v9 = vpop.permute.xlu0 %493  ;;  %v475_v11 = vsel %vm474_vm0, %v471_v8, %v473_v4  ;;  %vm533_vm0 = vcmask 588800  }
  0x8c   : > { %v496_v10 = vsel %vm495_vm2, %v492_v6, %v494_v9  ;;  %500 = vst.msk [vmem:[#allocation2 + $0x88] sm:$0xff] %vm495_vm2, %v494_v9 }
  0x8d   : > { %544 = vmatpush.msra.mxu0 %v496_v10  ;;  %507 = vst.msk [vmem:[#allocation2 + $0x88] sm:$0xff] %vm506_vm3, %v504_v5 }
  0x8f   : > { %545 = vmatpush.msra.mxu0 %v475_v11 }
  0x92   : > { %v452_v13 = vpop.permute.xlu1 %451  ;;  %v399_v27 = vpop.permute.xlu2 %398 }
  0x93   : > { %458 = vst.msk [vmem:[#allocation2 + $0x68] sm:$0xff] %vm453_vm4, %v452_v13  ;;  %v450_v14 = vpop.permute.xlu0 %449 }
  0x94   : > { %v454_v15 = vsel %vm453_vm4, %v450_v14, %v452_v13  ;;  %465 = vst.msk [vmem:[#allocation2 + $0x68] sm:$0xff] %vm464_vm5, %v462_v7  ;;  %v526_v16 = vld [vmem:[#allocation2 + $0x88] sm:$0xff] }
  0x95   : > { %546 = vmatpush.msra.mxu0 %v454_v15  ;;  %564 = vmatpush.msra.mxu1 %v526_v16 }
  0x97   : > { %565 = vmatpush.msra.mxu1 %v524_v17 }
  0x9a   : > { %v431_v18 = vpop.permute.xlu1 %430  ;;  %v378_v34 = vpop.permute.xlu2 %377 }
  0x9b   : > { %437 = vst.msk [vmem:[#allocation2 + $0x58] sm:$0xff] %vm432_vm6, %v431_v18  ;;  %v429_v19 = vpop.permute.xlu0 %428  ;;  %v522_v20 = vld [vmem:[#allocation2 + $0x68] sm:$0xff] }
  0x9c   : > { %v433_v22 = vsel %vm432_vm6, %v429_v19, %v431_v18  ;;  %444 = vst.msk [vmem:[#allocation2 + $0x58] sm:$0xff] %vm443_vm7, %v441_v12  ;;  %566 = vmatpush.msra.mxu1 %v522_v20 }
  0x9d   : > { %547 = vmatpush.msra.mxu0 %v433_v22 }
  0xa2   : > { %v410_v23 = vpop.permute.xlu1 %409  ;;  %v357_v39 = vpop.permute.xlu2 %356 }
  0xa3   : > { %416 = vst.msk [vmem:[#allocation2 + $0x48] sm:$0xff] %vm411_vm8, %v410_v23  ;;  %v408_v24 = vpop.permute.xlu0 %407  ;;  %v520_v25 = vld [vmem:[#allocation2 + $0x58] sm:$0xff] }
  0xa4   : > { %v412_v26 = vsel %vm411_vm8, %v408_v24, %v410_v23  ;;  %423 = vst.msk [vmem:[#allocation2 + $0x48] sm:$0xff] %vm422_vm9, %v420_v21  ;;  %567 = vmatpush.msra.mxu1 %v520_v25 }
  0xa5   : > { %548 = vmatpush.msra.mxu0 %v412_v26 }
  0xaa   : > { %v389_v30 = vpop.permute.xlu1 %388 }
  0xab   : > { %395 = vst.msk [vmem:[#allocation2 + $0x38] sm:$0xff] %vm390_vm10, %v389_v30  ;;  %v387_v31 = vpop.permute.xlu0 %386  ;;  %v518_v32 = vld [vmem:[#allocation2 + $0x48] sm:$0xff] }
  0xac   : > { %v391_v33 = vsel %vm390_vm10, %v387_v31, %v389_v30  ;;  %402 = vst.msk [vmem:[#allocation2 + $0x38] sm:$0xff] %vm401_vm11, %v399_v27  ;;  %568 = vmatpush.msra.mxu1 %v518_v32 }
  0xad   : > { %549 = vmatpush.msra.mxu0 %v391_v33 }
  0xb2   : > { %v368_v35 = vpop.permute.xlu1 %367 }
  0xb3   : > { %374 = vst.msk [vmem:[#allocation2 + $0x28] sm:$0xff] %vm369_vm12, %v368_v35  ;;  %v366_v36 = vpop.permute.xlu0 %365  ;;  %v516_v37 = vld [vmem:[#allocation2 + $0x38] sm:$0xff] }
  0xb4   : > { %v370_v38 = vsel %vm369_vm12, %v366_v36, %v368_v35  ;;  %381 = vst.msk [vmem:[#allocation2 + $0x28] sm:$0xff] %vm380_vm13, %v378_v34  ;;  %569 = vmatpush.msra.mxu1 %v516_v37 }
  0xb5   : > { %550 = vmatpush.msra.mxu0 %v370_v38 }
  0xba   : > { %v347_v40 = vpop.permute.xlu1 %346 }
  0xbb   : > { %353 = vst.msk [vmem:[#allocation2 + $0x18] sm:$0xff] %vm348_vm14, %v347_v40  ;;  %v345_v41 = vpop.permute.xlu0 %344  ;;  %v514_v42 = vld [vmem:[#allocation2 + $0x28] sm:$0xff] }
  0xbc   : > { %v349_v43 = vsel %vm348_vm14, %v345_v41, %v347_v40  ;;  %360 = vst.msk [vmem:[#allocation2 + $0x18] sm:$0xff] %vm359_vm15, %v357_v39  ;;  %570 = vmatpush.msra.mxu1 %v514_v42 }
  0xbd   : > { %551 = vmatpush.msra.mxu0 %v349_v43 }
  0xbf   : > { %552 = vmatpush.msra.mxu0 %v867_v1 }
  0xc0   : > { %741 = vmatmul.msk.f32.vlgmr.msra.gmra.mxu0 %vm533_vm0, %v508_v44 }
  0xc3   : > { %v512_v45 = vld [vmem:[#allocation2 + $0x18] sm:$0xff]  ;;  %v531_v46 = vpop.permute.xlu0 %530 }
  0xc4   : > { %571 = vmatpush.msra.mxu1 %v512_v45 }
  0xc6   : > { %572 = vmatpush.msra.mxu1 %v870_v2 }
  0xc7   : > { %742 = vmatmul.msk.f32.vlgmr.msra.gmra.mxu1 %vm533_vm0, %v508_v44 }
 0x13d   : > { %v554_v47 = vpop.f32.mrf.mxu0 }
 0x13e   : > { %v555_v48 = vadd.f32 %v554_v47, %v531_v46 }
 0x140   : > { %577 = vst [vmem:[%s334_s20] sm:$0xff] %v555_v48 }
 0x144   : > { %v574_v49 = vpop.f32.mrf.mxu1 }
 0x145   : > { %v575_v50 = vadd.f32 %v574_v49, %v531_v46 }
 0x147   : > { %578 = vst [vmem:[%s334_s20 + $0x8] sm:$0xff] %v575_v50 }
 0x148 PF: > { %s14_s17 = sadd.s32 1, %s803_s17   ;;  %s913_s15 = smov %s799_s16 }
 0x149   : > { %p11_p5 = scmp.ge.s32.totalorder %s14_s17, 4   ;;  %s914_s16 = smov %s916_s18 }
 0x14b   :  { %13 = sbr.rel (!%p11_p5) target bundleno = 2 (0x2), region = 75 }

</bundles_post_ra>
